<compile_context>
chip_gen: v7x
topology: tpu7x:2x2x1
jax: 0.10.0
libtpu: 0.0.40
codegen_flags: <defaults>
</compile_context>

<pallas_src>
import jax
import jax.numpy as jnp
from jax.experimental import pallas as pl
from jax.experimental.pallas import tpu as pltpu

_LANE = 128
_SUBLANE = 8
_TM_MAX = 256  # batch-tile rows; fits VMEM with margin on v5e/v6e/v7x


def _round_up(n, m):
    return (n + m - 1) // m * m


def _mlp_kernel(x_ref, w1_ref, b1_ref, w2_ref, b2_ref, out_ref, h_ref):
    # Hidden layer: bf16 MXU matmul with f32 accumulation, f32 bias + ReLU (VPU).
    h = jnp.dot(x_ref[...], w1_ref[...], preferred_element_type=jnp.float32)
    h = jnp.maximum(h + b1_ref[...], 0.0)
    # Stage through VMEM scratch: bounds vreg pressure between the two dots
    # and casts the activation to bf16 for the second MXU pass.
    h_ref[...] = h.astype(jnp.bfloat16)
    # Output layer (f32 accumulation, f32 bias add), lane-dense store.
    o = jnp.dot(h_ref[...], w2_ref[...], preferred_element_type=jnp.float32)
    out_ref[...] = (o + b2_ref[...]).astype(out_ref.dtype)


def predict_only_forward(x, w1, b1, w2, b2):
    """PredictOnlyWrapper.forward: out, _ = model(x); return out (KL discarded)."""
    batch, in_features = x.shape
    hidden = w1.shape[1]
    out_features = w2.shape[1]

    # ---- pad to lane-dense (x128) / sublane-aligned (x8) shapes ------------
    in_p = _round_up(in_features, _LANE)
    hid_p = _round_up(hidden, _LANE)
    out_p = _round_up(out_features, _LANE)
    tm = min(_TM_MAX, _round_up(batch, _SUBLANE))
    batch_p = _round_up(batch, tm)

    f32, bf16 = jnp.float32, jnp.bfloat16
    x_p = jnp.pad(x.astype(f32),
                  ((0, batch_p - batch), (0, in_p - in_features))).astype(bf16)
    w1_p = jnp.pad(w1.astype(f32),
                   ((0, in_p - in_features), (0, hid_p - hidden))).astype(bf16)
    b1_p = jnp.pad(b1.astype(f32), ((0, 0), (0, hid_p - hidden)))
    w2_p = jnp.pad(w2.astype(f32),
                   ((0, hid_p - hidden), (0, out_p - out_features))).astype(bf16)
    b2_p = jnp.pad(b2.astype(f32), ((0, 0), (0, out_p - out_features)))

    out_padded = pl.pallas_call(
        _mlp_kernel,
        out_shape=jax.ShapeDtypeStruct((batch_p, out_p), jnp.float32),
        grid=(batch_p // tm,),
        in_specs=[
            pl.BlockSpec((tm, in_p), lambda i: (i, 0)),      # x: tiled over batch
            pl.BlockSpec((in_p, hid_p), lambda i: (0, 0)),   # W1: VMEM-resident
            pl.BlockSpec((1, hid_p), lambda i: (0, 0)),      # b1: VMEM-resident
            pl.BlockSpec((hid_p, out_p), lambda i: (0, 0)),  # W2: VMEM-resident
            pl.BlockSpec((1, out_p), lambda i: (0, 0)),      # b2: VMEM-resident
        ],
        out_specs=pl.BlockSpec((tm, out_p), lambda i: (i, 0)),
        scratch_shapes=[pltpu.VMEM((tm, hid_p), jnp.bfloat16)],
        compiler_params=pltpu.CompilerParams(
            dimension_semantics=("parallel",),  # 2-TC sharding on v7x
        ),
    )(x_p, w1_p, b1_p, w2_p, b2_p)

    # The wrapped model's KL term is discarded by PredictOnlyWrapper, so it is
    # never computed here.
    return out_padded[:batch, :out_features]


def _reference_forward(x, w1, b1, w2, b2):
    # Same math / same precision choices as the kernel (bf16 MXU inputs,
    # f32 accumulation, f32 bias + ReLU).
    xb, w1b, w2b = (a.astype(jnp.bfloat16) for a in (x, w1, w2))
    h = jnp.maximum(jnp.dot(xb, w1b, preferred_element_type=jnp.float32) + b1, 0.0)
    return jnp.dot(h.astype(jnp.bfloat16), w2b,
                   preferred_element_type=jnp.float32) + b2


if __name__ == "__main__":
    key = jax.random.PRNGKey(0)
    kx, k1, kb1, k2, kb2 = jax.random.split(key, 5)

    batch, in_features, hidden, out_features = 8, 32, 64, 16

    x = jax.random.normal(kx, (batch, in_features), dtype=jnp.float32)
    w1 = jax.random.normal(k1, (in_features, hidden), dtype=jnp.float32) * 0.1
    b1 = jax.random.normal(kb1, (1, hidden), dtype=jnp.float32) * 0.01
    w2 = jax.random.normal(k2, (hidden, out_features), dtype=jnp.float32) * 0.1
    b2 = jax.random.normal(kb2, (1, out_features), dtype=jnp.float32) * 0.01

    out = predict_only_forward(x, w1, b1, w2, b2)
    jax.block_until_ready(out)
    assert out.shape == (batch, out_features)

    # Check against a same-precision (bf16-input / f32-accum) JAX reference.
    ref_bf16 = _reference_forward(x, w1, b1, w2, b2)
    assert jnp.allclose(out, ref_bf16, atol=1e-2, rtol=1e-2)

    # Sanity check against the pure-f32 reference (looser: bf16 rounding).
    ref_f32 = jnp.maximum(x @ w1 + b1, 0.0) @ w2 + b2
    assert jnp.allclose(out, ref_f32, atol=5e-2, rtol=5e-2)

    print("KERNEL_OK")
</pallas_src>

<mosaic_0001>
module attributes {stable_mosaic.version = 11 : i64} {
  func.func @_mlp_kernel(%arg0: i32, %arg1: memref<8x128xbf16, #tpu.memory_space<vmem>>, %arg2: memref<128x128xbf16, #tpu.memory_space<vmem>>, %arg3: memref<1x128xf32, #tpu.memory_space<vmem>>, %arg4: memref<128x128xbf16, #tpu.memory_space<vmem>>, %arg5: memref<1x128xf32, #tpu.memory_space<vmem>>, %arg6: memref<8x128xf32, #tpu.memory_space<vmem>>, %arg7: memref<8x128xbf16, #tpu.memory_space<vmem>>) attributes {dimension_semantics = [#tpu.dimension_semantics<parallel>], iteration_bounds = array<i64: 1>, scalar_prefetch = 0 : i64, scratch_operands = 1 : i64, tpu.core_type = #tpu.core_type<tc>, window_params = [{transform_indices = @transform_0, window_bounds = array<i64: 8, 128>}, {pipeline_mode = #tpu.pipeline_mode<synchronous>, transform_indices = @transform_1, window_bounds = array<i64: 128, 128>}, {pipeline_mode = #tpu.pipeline_mode<synchronous>, transform_indices = @transform_2, window_bounds = array<i64: 1, 128>}, {pipeline_mode = #tpu.pipeline_mode<synchronous>, transform_indices = @transform_3, window_bounds = array<i64: 128, 128>}, {pipeline_mode = #tpu.pipeline_mode<synchronous>, transform_indices = @transform_4, window_bounds = array<i64: 1, 128>}, {transform_indices = @transform_5, window_bounds = array<i64: 8, 128>}]} {
    %c0 = arith.constant 0 : index
    %c0_0 = arith.constant 0 : index
    %0 = vector.load %arg1[%c0, %c0_0] : memref<8x128xbf16, #tpu.memory_space<vmem>>, vector<8x128xbf16>
    %c0_1 = arith.constant 0 : index
    %c0_2 = arith.constant 0 : index
    %1 = vector.load %arg2[%c0_1, %c0_2] : memref<128x128xbf16, #tpu.memory_space<vmem>>, vector<128x128xbf16>
    %cst = arith.constant dense<0.000000e+00> : vector<8x128xf32>
    %2 = tpu.matmul %0, %1, %cst {dimension_numbers = #tpu.dot_dimension_numbers<[1], [0], [0], [1], [0, 0, 1, 1], [], []>} : vector<8x128xbf16>, vector<128x128xbf16>, vector<8x128xf32> -> vector<8x128xf32>
    %c0_3 = arith.constant 0 : index
    %c0_4 = arith.constant 0 : index
    %3 = vector.load %arg3[%c0_3, %c0_4] : memref<1x128xf32, #tpu.memory_space<vmem>>, vector<1x128xf32>
    %4 = vector.broadcast %3 : vector<1x128xf32> to vector<8x128xf32>
    %5 = arith.addf %2, %4 : vector<8x128xf32>
    %cst_5 = arith.constant 0.000000e+00 : f32
    %6 = vector.broadcast %cst_5 : f32 to vector<8x128xf32>
    %7 = arith.maximumf %5, %6 : vector<8x128xf32>
    %8 = arith.truncf %7 : vector<8x128xf32> to vector<8x128xbf16>
    %c0_6 = arith.constant 0 : index
    %c0_7 = arith.constant 0 : index
    %9 = vector.load %arg7[%c0_6, %c0_7] : memref<8x128xbf16, #tpu.memory_space<vmem>>, vector<8x128xbf16>
    tpu.vector_store %arg7[%c0_6, %c0_7], %8 {strides = array<i32>} : memref<8x128xbf16, #tpu.memory_space<vmem>>, vector<8x128xbf16>,
    %c0_8 = arith.constant 0 : index
    %c0_9 = arith.constant 0 : index
    %10 = vector.load %arg7[%c0_8, %c0_9] : memref<8x128xbf16, #tpu.memory_space<vmem>>, vector<8x128xbf16>
    %c0_10 = arith.constant 0 : index
    %c0_11 = arith.constant 0 : index
    %11 = vector.load %arg4[%c0_10, %c0_11] : memref<128x128xbf16, #tpu.memory_space<vmem>>, vector<128x128xbf16>
    %cst_12 = arith.constant dense<0.000000e+00> : vector<8x128xf32>
    %12 = tpu.matmul %10, %11, %cst_12 {dimension_numbers = #tpu.dot_dimension_numbers<[1], [0], [0], [1], [0, 0, 1, 1], [], []>} : vector<8x128xbf16>, vector<128x128xbf16>, vector<8x128xf32> -> vector<8x128xf32>
    %c0_13 = arith.constant 0 : index
    %c0_14 = arith.constant 0 : index
    %13 = vector.load %arg5[%c0_13, %c0_14] : memref<1x128xf32, #tpu.memory_space<vmem>>, vector<1x128xf32>
    %14 = vector.broadcast %13 : vector<1x128xf32> to vector<8x128xf32>
    %15 = arith.addf %12, %14 : vector<8x128xf32>
    %c0_15 = arith.constant 0 : index
    %c0_16 = arith.constant 0 : index
    %16 = vector.load %arg6[%c0_15, %c0_16] : memref<8x128xf32, #tpu.memory_space<vmem>>, vector<8x128xf32>
    tpu.vector_store %arg6[%c0_15, %c0_16], %15 {strides = array<i32>} : memref<8x128xf32, #tpu.memory_space<vmem>>, vector<8x128xf32>,
    return
  }
  func.func @transform_0(%arg0: i32) -> (i32, i32) {
    %c0_i32 = arith.constant 0 : i32
    %c0_i32_0 = arith.constant 0 : i32
    return %arg0, %c0_i32 : i32, i32
  }
  func.func @transform_1(%arg0: i32) -> (i32, i32) {
    %c0_i32 = arith.constant 0 : i32
    %c0_i32_0 = arith.constant 0 : i32
    %c0_i32_1 = arith.constant 0 : i32
    return %c0_i32, %c0_i32_0 : i32, i32
  }
  func.func @transform_2(%arg0: i32) -> (i32, i32) {
    %c0_i32 = arith.constant 0 : i32
    %c0_i32_0 = arith.constant 0 : i32
    %c0_i32_1 = arith.constant 0 : i32
    return %c0_i32, %c0_i32_0 : i32, i32
  }
  func.func @transform_3(%arg0: i32) -> (i32, i32) {
    %c0_i32 = arith.constant 0 : i32
    %c0_i32_0 = arith.constant 0 : i32
    %c0_i32_1 = arith.constant 0 : i32
    return %c0_i32, %c0_i32_0 : i32, i32
  }
  func.func @transform_4(%arg0: i32) -> (i32, i32) {
    %c0_i32 = arith.constant 0 : i32
    %c0_i32_0 = arith.constant 0 : i32
    %c0_i32_1 = arith.constant 0 : i32
    return %c0_i32, %c0_i32_0 : i32, i32
  }
  func.func @transform_5(%arg0: i32) -> (i32, i32) {
    %c0_i32 = arith.constant 0 : i32
    %c0_i32_0 = arith.constant 0 : i32
    return %arg0, %c0_i32 : i32, i32
  }
}

</mosaic_0001>

<bundles_post_ra>
// kernel: tpu_custom_call.1
= control target key start
LH: loop header
LB: loop body
LE: loop exit
PB: predicated region body
PF: predicated region fallthrough
CT: control target
= control target key end

     0   :  { %10 = vsyncpa [#allocation4], 0  ;;  %s597_s0 = inlined_call_operand.hbm [shape: bf16[8,128], index: 0, kind: input, shape index: {}]   ;;  %s598_s1 = inlined_call_operand.hbm [shape: bf16[128,128], index: 1, kind: input, shape index: {}]   ;;  %s599_s2 = inlined_call_operand.vmem [shape: f32[1,128], index: 2, kind: input, shape index: {}]   ;;  %s600_s3 = inlined_call_operand.hbm [shape: bf16[128,128], index: 3, kind: input, shape index: {}]   ;;  %s601_s4 = inlined_call_operand.vmem [shape: f32[1,128], index: 4, kind: input, shape index: {}]   ;;  %s602_s5 = inlined_call_operand.hbm [shape: f32[8,128], index: 5, kind: output, shape index: {}]  }
   0x1   :  { %11 = vsyncpa [#allocation7], 0 }
   0x2   :  { %12 = vsyncpa [#allocation5], 0  ;;  %s499_s18 = smov [#allocation6]   ;;  %s405_s22 = scalar_lea.hbm %s598_s1, 1024 }
   0x3   :  { %s28_s19 = sshll.u32 %s499_s18, 4  ;;  %p406_p0 = scmp.ne.s32.totalorder %s598_s1, %s405_s22  ;;  %s29_s19 = int_to_ptr.vmem [resolvable:$true] %s28_s19 }
   0x4   :  { %p409_p1 = scmp.lt.u32.totalorder %s405_s22, %s598_s1 }
   0x6   :  { %p411_p2 = pnand %p409_p1, %p406_p0 }
   0x8   :  { %414 = shalt.err (!%p411_p2)
}
   0x9   :  { %s415_s27 = scalar_lea.vmem %s29_s19, 1024  ;;  %p420_p4 = scmp.lt.s32.totalorder %s29_s19, %s29_s19 }
   0xa   :  { %p416_p3 = scmp.ne.s32.totalorder %s29_s19, %s415_s27  ;;  %p421_p5 = scmp.lt.s32.totalorder %s415_s27, %s415_s27 }
   0xc   :  { %p422_p6 = por %p421_p5, %p420_p4 }
   0xe   :  { %p423_p7 = pnand %p422_p6, %p416_p3 }
  0x10   :  { %426 = shalt.err (!%p423_p7)
}
  0x11   :  { %s500_s28 = smov 64   ;;  %s501_s29 = smov 4  }
  0x12   :  { %34 = dma.hbm_to_vmem [thread:$0]  %s598_s1, 1024, %s29_s19, [#allocation7], %s500_s28, %s500_s28, %s501_s29  }
  0x13   :  { %s502_s7 = smov [#allocation3]   ;;  %s503_s9 = smov [#allocation8]  }
  0x14   :  { %s19_s8 = sshll.u32 %s502_s7, 4  ;;  %s42_s10 = sshll.u32 %s503_s9, 4  ;;  %s20_s8 = int_to_ptr.vmem [resolvable:$true] %s19_s8  ;;  %s43_s10 = int_to_ptr.vmem [resolvable:$true] %s42_s10 }
  0x15   :  { %s427_s13 = scalar_lea.hbm %s597_s0, 64 }
  0x16   :  { %p428_p8 = scmp.ne.s32.totalorder %s597_s0, %s427_s13  ;;  %p431_p9 = scmp.lt.u32.totalorder %s427_s13, %s597_s0 }
  0x18   :  { %p433_p10 = pnand %p431_p9, %p428_p8 }
  0x1a   :  { %436 = shalt.err (!%p433_p10)
}
  0x1b   :  { %s437_s1 = scalar_lea.vmem %s20_s8, 64  ;;  %p442_p12 = scmp.lt.s32.totalorder %s20_s8, %s20_s8 }
  0x1c   :  { %p438_p11 = scmp.ne.s32.totalorder %s20_s8, %s437_s1  ;;  %p443_p13 = scmp.lt.s32.totalorder %s437_s1, %s437_s1 }
  0x1e   :  { %p444_p0 = por %p443_p13, %p442_p12 }
  0x20   :  { %p445_p1 = pnand %p444_p0, %p438_p11 }
  0x22   :  { %448 = shalt.err (!%p445_p1)
}
  0x23   :  { %22 = dma.hbm_to_vmem [thread:$0]  %s597_s0, 64, %s20_s8, [#allocation4]  }
  0x24   :  { %s449_s22 = scalar_lea.hbm %s600_s3, 1024 }
  0x25   :  { %p450_p2 = scmp.ne.s32.totalorder %s600_s3, %s449_s22  ;;  %p453_p3 = scmp.lt.u32.totalorder %s449_s22, %s600_s3 }
  0x27   :  { %p455_p4 = pnand %p453_p3, %p450_p2 }
  0x29   :  { %458 = shalt.err (!%p455_p4)
}
  0x2a   :  { %s459_s27 = scalar_lea.vmem %s43_s10, 1024  ;;  %p464_p6 = scmp.lt.s32.totalorder %s43_s10, %s43_s10 }
  0x2b   :  { %p460_p5 = scmp.ne.s32.totalorder %s43_s10, %s459_s27  ;;  %p465_p7 = scmp.lt.s32.totalorder %s459_s27, %s459_s27 }
  0x2d   :  { %p466_p8 = por %p465_p7, %p464_p6 }
  0x2f   :  { %p467_p9 = pnand %p466_p8, %p460_p5 }
  0x31   :  { %470 = shalt.err (!%p467_p9)
}
  0x32   :  { %48 = dma.hbm_to_vmem [thread:$0]  %s600_s3, 1024, %s43_s10, [#allocation7], %s500_s28, %s500_s28, %s501_s29  }
  0x33   :  { %493 = dma.done.wait [#allocation4], 64  }
  0x34   :  { %494 = vsyncadd [#allocation4], 4294967232 }
  0x35   :  { %495 = dma.done.wait [#allocation7], 2048  }
  0x36   :  { %496 = vsyncadd [#allocation7], 4294965248  ;;  %v504_v0 = vmov 0.0   ;;  %vm505_vm0 = vmmov 0   ;;  %v389_v1 = vld [vmem:[#allocation6] sm:$0xff]   ;;  %v390_v2 = vld [vmem:[#allocation6 + $0x8] sm:$0xff]  }
  0x37   :  { %341 = vmatprep.subr.bf16.mxu0 %v504_v0  ;;  %357 = vmatprep.mubr.msk.bf16.mxu0 %vm505_vm0, %v504_v0  ;;  %v391_v3 = vld [vmem:[#allocation6 + $0x10] sm:$0xff]   ;;  %v397_v4 = vld [vmem:[#allocation8] sm:$0xff]   ;;  %v392_v5 = vld [vmem:[#allocation6 + $0x18] sm:$0xff]   ;;  %s506_s7 = smov [#allocation9]  }
  0x38   :  { %361 = vmatprep.subr.bf16.mxu1 %v504_v0  ;;  %377 = vmatprep.mubr.msk.bf16.mxu1 %vm505_vm0, %v504_v0  ;;  %v398_v6 = vld [vmem:[#allocation8 + $0x8] sm:$0xff]   ;;  %v393_v7 = vld [vmem:[#allocation6 + $0x20] sm:$0xff]   ;;  %v399_v8 = vld [vmem:[#allocation8 + $0x10] sm:$0xff]   ;;  %s295_s8 = sshll.u32 %s506_s7, 4  ;;  %s296_s8 = int_to_ptr.vmem [resolvable:$true] %s295_s8 }
  0x39   :  { %342 = vmatpush3.bf16.msra.mxu0 %v389_v1  ;;  %362 = vmatpush3.bf16.msra.mxu1 %v397_v4  ;;  %v394_v9 = vld [vmem:[#allocation6 + $0x28] sm:$0xff]   ;;  %v400_v10 = vld [vmem:[#allocation8 + $0x18] sm:$0xff]   ;;  %v395_v11 = vld [vmem:[#allocation6 + $0x30] sm:$0xff]   ;;  %p476_p11 = scmp.lt.s32.totalorder %s296_s8, %s296_s8 }
  0x3a   :  { %343 = vmatprep.subr.bf16.mxu0 %v504_v0  ;;  %363 = vmatprep.subr.bf16.mxu1 %v504_v0  ;;  %v396_v12 = vld [vmem:[#allocation6 + $0x38] sm:$0xff]   ;;  %v401_v14 = vld [vmem:[#allocation8 + $0x20] sm:$0xff]   ;;  %v402_v15 = vld [vmem:[#allocation8 + $0x28] sm:$0xff]  }
  0x3b   :  { %v61_v13 = vld [vmem:[#allocation3] sm:$0xf]  ;;  %v403_v16 = vld [vmem:[#allocation8 + $0x30] sm:$0xff]   ;;  %v305_v18 = vld [vmem:[%s599_s2] ss:$0 sm:$0xff]  ;;  %s471_s2 = scalar_lea.vmem %s296_s8, 128 }
  0x3c   :  { %v404_v17 = vld [vmem:[#allocation8 + $0x38] sm:$0xff]   ;;  %p472_p10 = scmp.ne.s32.totalorder %s296_s8, %s471_s2  ;;  %p477_p12 = scmp.lt.s32.totalorder %s471_s2, %s471_s2 }
  0x3d   :  { %344 = vmatpush3.bf16.msra.mxu0 %v390_v2  ;;  %364 = vmatpush3.bf16.msra.mxu1 %v398_v6  ;;  %v314_v27 = vld [vmem:[%s601_s4] ss:$0 sm:$0xff] }
  0x3e   :  { %345 = vmatprep.subr.bf16.mxu0 %v504_v0  ;;  %365 = vmatprep.subr.bf16.mxu1 %v504_v0  ;;  %p478_p13 = por %p477_p12, %p476_p11 }
  0x40   :  { %p479_p0 = pnand %p478_p13, %p472_p10 }
  0x41   :  { %346 = vmatpush3.bf16.msra.mxu0 %v391_v3  ;;  %366 = vmatpush3.bf16.msra.mxu1 %v399_v8 }
  0x42   :  { %347 = vmatprep.subr.bf16.mxu0 %v504_v0  ;;  %367 = vmatprep.subr.bf16.mxu1 %v504_v0 }
  0x45   :  { %348 = vmatpush3.bf16.msra.mxu0 %v392_v5  ;;  %368 = vmatpush3.bf16.msra.mxu1 %v400_v10 }
  0x46   :  { %349 = vmatprep.subr.bf16.mxu0 %v504_v0  ;;  %369 = vmatprep.subr.bf16.mxu1 %v504_v0 }
  0x49   :  { %350 = vmatpush3.bf16.msra.mxu0 %v393_v7  ;;  %370 = vmatpush3.bf16.msra.mxu1 %v401_v14 }
  0x4a   :  { %351 = vmatprep.subr.bf16.mxu0 %v504_v0  ;;  %371 = vmatprep.subr.bf16.mxu1 %v504_v0 }
  0x4d   :  { %352 = vmatpush3.bf16.msra.mxu0 %v394_v9  ;;  %372 = vmatpush3.bf16.msra.mxu1 %v402_v15 }
  0x4e   :  { %353 = vmatprep.subr.bf16.mxu0 %v504_v0  ;;  %373 = vmatprep.subr.bf16.mxu1 %v504_v0 }
  0x51   :  { %354 = vmatpush3.bf16.msra.mxu0 %v395_v11  ;;  %374 = vmatpush3.bf16.msra.mxu1 %v403_v16 }
  0x52   :  { %355 = vmatprep.subr.bf16.mxu0 %v504_v0  ;;  %375 = vmatprep.subr.bf16.mxu1 %v504_v0 }
  0x55   :  { %356 = vmatpush3.bf16.msra.mxu0 %v396_v12  ;;  %376 = vmatpush3.bf16.msra.mxu1 %v404_v17 }
  0x58   :  { %358 = vmatmul.mubr.bf16.vlgmr.msra.gmra.mrb[0].mxu0 %v61_v13 }
 0x12b   :  { %v167_v19 = vpop.f32.mrb[0].mxu0 }
 0x12c   :  { %v168_v20 = vadd.f32 %v305_v18, %v167_v19  ;;  %v359_v21 = vpop.f32.mrb[1].mxu0 }
 0x12d   :  { %v170_v22 = vpop.f32.mrb[2].mxu0 }
 0x12e   :  { %v173_v23 = vmax.f32 %v168_v20, 0.0  ;;  %v360_v24 = vpop.f32.mrb[3].mxu0 }
 0x130   :  { %v174_v25 = vpack.c.bf16 %v173_v23, %v173_v23 }
 0x132   :  { %175 = vst [vmem:[#allocation2] sm:$0xf] %v174_v25 }
 0x139   :  { %v176_v26 = vld [vmem:[#allocation2] sm:$0xf] }
 0x13a   :  { %378 = vmatmul.mubr.bf16.vlgmr.msra.gmra.mrb[0].mxu1 %v176_v26 }
 0x20d   :  { %v282_v28 = vpop.f32.mrb[0].mxu1 }
 0x20e   :  { %v283_v29 = vadd.f32 %v314_v27, %v282_v28  ;;  %v379_v30 = vpop.f32.mrb[1].mxu1 }
 0x20f   :  { %v285_v31 = vpop.f32.mrb[2].mxu1 }
 0x210   :  { %288 = vst [vmem:[#allocation9] sm:$0xff] %v283_v29  ;;  %v380_v32 = vpop.f32.mrb[3].mxu1 }
 0x211   :  { %482 = shalt.err (!%p479_p0)
}
 0x212   :  { %s483_s4 = scalar_lea.hbm %s602_s5, 128 }
 0x213   :  { %p484_p1 = scmp.ne.s32.totalorder %s602_s5, %s483_s4  ;;  %p487_p2 = scmp.lt.u32.totalorder %s483_s4, %s602_s5 }
 0x215   :  { %p489_p3 = pnand %p487_p2, %p484_p1 }
 0x217   :  { %492 = shalt.err (!%p489_p3)
}
 0x218   :  { %298 = dma.vmem_to_hbm [thread:$0]  %s296_s8, 128, %s602_s5, [#allocation5]  }
 0x219   :  { %497 = dma.done.wait [#allocation5], 128  }
 0x21a   :  { %498 = vsyncadd [#allocation5], 4294967168 }
 0x21b   :  { %302 = vsyncpa [#allocation4], 1 }
 0x21c   :  { %303 = vsyncpa [#allocation7], 1 }
 0x21d   :  { %304 = vsyncpa [#allocation5], 1 }

</bundles_post_ra>
